<compile_context>
chip_gen: v7x
topology: tpu7x:2x2x1
jax: 0.10.0
libtpu: 0.0.40
codegen_flags: <defaults>
</compile_context>

<pallas_src>
import functools
import math

import jax
import jax.numpy as jnp
from jax import lax
from jax.experimental import pallas as pl
from jax.experimental.pallas import tpu as pltpu

_LANES = 128
_INV_SQRT2 = 0.7071067811865476


def _round_up(x, m):
    return ((x + m - 1) // m) * m


def _gelu_exact(x):
    # GELU with approximate='none': 0.5 * x * (1 + erf(x / sqrt(2)))
    return 0.5 * x * (1.0 + lax.erf(x * _INV_SQRT2))


def _layer_norm(x, eps=1e-5):
    mu = jnp.mean(x, axis=-1, keepdims=True)
    var = jnp.mean((x - mu) ** 2, axis=-1, keepdims=True)
    return (x - mu) * lax.rsqrt(var + eps)


# --------------------------------------------------------------------------- #
# Kernel
# --------------------------------------------------------------------------- #
def _classifier_head_kernel(
    x_ref,      # (TB, Sp, KD)   lane-packed particles (k tokens per row)
    jet_ref,    # (TB, J)
    w1_ref,     # (J, 2D)
    b1_ref,     # (1, 2D)
    w2_ref,     # (2D, D)
    b2_ref,     # (1, D)
    lnw_ref,    # (1, D)         classifier LayerNorm weight
    lnb_ref,    # (1, D)         classifier LayerNorm bias
    ones_ref,   # (KD, KD)       block-diagonal segment-sum matrix
    col_ref,    # (KD, D)        segment-collapse matrix
    wc_ref,     # (D, 256)       classifier weight, cols [0, C)
    wr_ref,     # (D, 256)       regressor  weight, cols [128, 128+J)
    bh_ref,     # (1, 256)       fused head bias
    out_ref,    # (TB, 256)      lane-dense slab: [0:128)=class, [128:256)=reg
    *, s_chunk, n_chunks, seq_len, seg_dim, eps=1e-5,
):
    f32 = jnp.float32

    # ---- jet embedding: Linear -> GELU -> Linear -> GELU (tiny, VMEM-resident) ----
    jet = jet_ref[...]
    h = jnp.dot(jet, w1_ref[...], preferred_element_type=f32) + b1_ref[...]
    h = _gelu_exact(h)
    jet_emb = jnp.dot(h, w2_ref[...], preferred_element_type=f32) + b2_ref[...]
    jet_emb = _gelu_exact(jet_emb)                         # (TB, D)

    tb = x_ref.shape[0]
    kd = x_ref.shape[-1]
    inv_d = 1.0 / seg_dim
    ones_blk = ones_ref[...]

    # ---- particle branch: streamed segmented LayerNorm + sum over tokens ----
    # One-pass stats (sum x, sum x^2) per D-lane segment via a block-diagonal
    # ones matmul on the MXU; the matmul output already carries the per-segment
    # broadcast, so no XLU lane reductions are needed in the hot loop.
    def ln_sum_chunk(xc):                                  # xc: (tb, sc, kd)
        rows = xc.shape[0] * xc.shape[1]
        x2d = xc.reshape(rows, kd)                         # sublane-merge (sc % 8 == 0)
        seg_sum = jnp.dot(x2d, ones_blk, preferred_element_type=f32)
        seg_sq = jnp.dot(x2d * x2d, ones_blk, preferred_element_type=f32)
        mu = seg_sum * inv_d
        var = jnp.maximum(seg_sq * inv_d - mu * mu, 0.0)
        xn = (x2d - mu) * lax.rsqrt(var + eps)
        return jnp.sum(xn.reshape(xc.shape), axis=1)       # (tb, kd)

    if n_chunks == 1:
        acc = ln_sum_chunk(x_ref[...])
    else:
        def body(c, acc):
            start = pl.multiple_of(c * s_chunk, s_chunk)
            return acc + ln_sum_chunk(x_ref[:, pl.ds(start, s_chunk), :])
        acc = lax.fori_loop(0, n_chunks, body, jnp.zeros((tb, kd), f32),
                            unroll=(n_chunks <= 4))

    # collapse the k packed segments -> (TB, D), then mean over original S tokens
    feat = jnp.dot(acc, col_ref[...], preferred_element_type=f32) * (1.0 / seq_len)
    feat = feat + jet_emb                                   # (TB, D)

    # ---- classifier: LayerNorm(affine) + Linear; regressor: Linear ----
    cf = _layer_norm(feat, eps) * lnw_ref[...] + lnb_ref[...]
    out = (jnp.dot(cf, wc_ref[...], preferred_element_type=f32)
           + jnp.dot(feat, wr_ref[...], preferred_element_type=f32)
           + bh_ref[...])

    # single lane-dense, unmasked 256-wide store
    out_ref[...] = out


# --------------------------------------------------------------------------- #
# Tiling helpers
# --------------------------------------------------------------------------- #
def _vmem_capacity_bytes():
    try:
        return int(pltpu.get_tpu_info().vmem_capacity_bytes)
    except Exception:
        return 64 << 20  # conservative (v7x per-TC); yields a 48 MiB scoped limit


def _choose_batch_tile(B, sp_pad, kd_pad, x_budget):
    """Batch tile: fits the double-buffered padded x block in `x_budget`,
    TB % 8 == 0 (or TB == B), and >= 2 grid steps whenever B >= 16."""
    row_bytes = 2 * sp_pad * kd_pad * 4          # double-buffered f32, lane-padded
    cap = max(1, x_budget // row_bytes)
    if B <= cap and B < 16:
        return B, B                              # single full-dim block (tiny batches)
    tb = min(cap, (B + 1) // 2)                  # at least 2 grid steps
    tb = max(8, (tb // 8) * 8)                   # sublane-aligned tiles
    b_pad = _round_up(B, tb)
    return tb, b_pad


def _choose_seq_chunk(sp_pad, tb, kd_pad, temp_budget=4 << 20):
    """Chunk of the packed sequence axis: multiple of 8, divides sp_pad, and
    keeps ~4 live (tb*sc, kd_pad) f32 temporaries under `temp_budget`."""
    per_row = 4 * tb * kd_pad * 4
    sc = max(8, (temp_budget // per_row) // 8 * 8)
    sc = min(sc, sp_pad)
    while sp_pad % sc:
        sc -= 8
    return sc


def _full_spec(arr):
    nd = arr.ndim
    return pl.BlockSpec(arr.shape, lambda i, _nd=nd: (0,) * _nd)


# --------------------------------------------------------------------------- #
# Wrapper
# --------------------------------------------------------------------------- #
def classifier_head(x, jet, params, *, mask=None):
    # mask is intentionally unused in the simple=True branch (matches PyTorch).
    del mask
    B, S, D = x.shape
    J = jet.shape[-1]
    C = params["wc"].shape[-1]
    assert C <= _LANES and J <= _LANES

    x = x.astype(jnp.float32)
    jet = jet.astype(jnp.float32)

    # ---- lane packing: k tokens per 128-lane row (zero token padding is exact) ----
    k = max(1, _LANES // D)
    KD = k * D
    s_k = _round_up(S, k)
    if s_k != S:
        x = jnp.pad(x, ((0, 0), (0, s_k - S), (0, 0)))
    sp = s_k // k
    xp = x.reshape(B, sp, KD)
    sp_pad = _round_up(sp, 8)                    # sublane-aligned packed-seq axis
    if sp_pad != sp:
        xp = jnp.pad(xp, ((0, 0), (0, sp_pad - sp), (0, 0)))

    # ---- generation-aware VMEM budgets (lane-padding aware) ----
    kd_pad = _round_up(KD, 128)
    vmem_cap = _vmem_capacity_bytes()
    vmem_limit_hi = min(vmem_cap * 3 // 4, 112 << 20)   # ~48 MiB v7x, ~96 MiB v5e/v6e
    TB, B_pad = _choose_batch_tile(B, sp_pad, kd_pad, vmem_limit_hi // 2)
    if B_pad != B:
        xp = jnp.pad(xp, ((0, B_pad - B), (0, 0), (0, 0)))
        jet = jnp.pad(jet, ((0, B_pad - B), (0, 0)))
    SCp = _choose_seq_chunk(sp_pad, TB, kd_pad)
    n_chunks = sp_pad // SCp
    grid = (B_pad // TB,)

    # ---- constant matrices for the segmented LayerNorm (built once per call) ----
    seg = jnp.arange(KD) // D
    ones_blk = (seg[:, None] == seg[None, :]).astype(jnp.float32)      # (KD, KD)
    lane = jnp.arange(KD) % D
    collapse = (lane[:, None] == jnp.arange(D)[None, :]).astype(jnp.float32)  # (KD, D)

    # ---- fused, lane-padded head weights / bias (single 256-wide store) ----
    wc_big = jnp.zeros((D, 2 * _LANES), jnp.float32).at[:, :C].set(params["wc"])
    wr_big = jnp.zeros((D, 2 * _LANES), jnp.float32).at[:, _LANES:_LANES + J].set(params["wr"])
    b_head = jnp.zeros((1, 2 * _LANES), jnp.float32)
    b_head = b_head.at[:, :C].set(params["bc"]).at[:, _LANES:_LANES + J].set(params["br"])

    # ---- VMEM estimate (lane/sublane-padded) for the scoped limit ----
    est = 4 * (
        2 * TB * sp_pad * kd_pad            # x double buffer
        + 2 * TB * 128                      # jet double buffer (J lane-padded)
        + 2 * TB * 2 * _LANES               # output double buffer
        + kd_pad * kd_pad + kd_pad * 128    # ones_blk, collapse
        + 2 * max(D, 8) * 2 * _LANES        # head weights
        + 4 * TB * SCp * kd_pad             # streaming-chunk temporaries
        + 16 * 128 * 8                      # small params / headroom
    )
    vmem_limit = int(min(max(est * 3 // 2, 32 << 20), vmem_limit_hi))

    kernel = functools.partial(
        _classifier_head_kernel,
        s_chunk=SCp, n_chunks=n_chunks, seq_len=S, seg_dim=D)

    out = pl.pallas_call(
        kernel,
        out_shape=jax.ShapeDtypeStruct((B_pad, 2 * _LANES), jnp.float32),
        grid=grid,
        in_specs=[
            pl.BlockSpec((TB, sp_pad, KD), lambda i: (i, 0, 0)),
            pl.BlockSpec((TB, J), lambda i: (i, 0)),
            _full_spec(params["w1"]), _full_spec(params["b1"]),
            _full_spec(params["w2"]), _full_spec(params["b2"]),
            _full_spec(params["ln_w"]), _full_spec(params["ln_b"]),
            _full_spec(ones_blk), _full_spec(collapse),
            _full_spec(wc_big), _full_spec(wr_big), _full_spec(b_head),
        ],
        out_specs=pl.BlockSpec((TB, 2 * _LANES), lambda i: (i, 0)),
        compiler_params=pltpu.CompilerParams(
            dimension_semantics=("parallel",),
            vmem_limit_bytes=vmem_limit,
        ),
    )(xp, jet,
      params["w1"], params["b1"], params["w2"], params["b2"],
      params["ln_w"], params["ln_b"], ones_blk, collapse,
      wc_big, wr_big, b_head)

    class_out = out[:B, :C]
    reg_out = out[:B, _LANES:_LANES + J]
    return class_out, reg_out


# --------------------------------------------------------------------------- #
# Params / reference
# --------------------------------------------------------------------------- #
def init_params(key, projection_dim, num_jet, num_classes):
    D, J, C = projection_dim, num_jet, num_classes
    ks = jax.random.split(key, 4)

    def lin(k, fan_in, fan_out):
        bound = 1.0 / math.sqrt(fan_in)
        return jax.random.uniform(k, (fan_in, fan_out), jnp.float32, -bound, bound)

    return {
        "w1": lin(ks[0], J, 2 * D),
        "b1": jnp.zeros((1, 2 * D), jnp.float32) + 0.01,
        "w2": lin(ks[1], 2 * D, D),
        "b2": jnp.zeros((1, D), jnp.float32) - 0.01,
        "ln_w": jnp.ones((1, D), jnp.float32),
        "ln_b": jnp.zeros((1, D), jnp.float32),
        "wc": lin(ks[2], D, C),
        "bc": jnp.zeros((1, C), jnp.float32),
        "wr": lin(ks[3], D, J),
        "br": jnp.zeros((1, J), jnp.float32),
    }


def reference(x, jet, params):
    # plain-JAX reference matching the PyTorch semantics (simple=True)
    h = _gelu_exact(jet @ params["w1"] + params["b1"])
    jet_emb = _gelu_exact(h @ params["w2"] + params["b2"])
    xn = _layer_norm(x)
    feat = jnp.mean(xn, axis=1) + jet_emb
    cf = _layer_norm(feat) * params["ln_w"] + params["ln_b"]
    return cf @ params["wc"] + params["bc"], feat @ params["wr"] + params["br"]


# --------------------------------------------------------------------------- #
if __name__ == "__main__":
    projection_dim, num_jet, num_classes = 32, 4, 5
    key = jax.random.PRNGKey(0)
    kp, k1, k2, k3, k4 = jax.random.split(key, 5)
    params = init_params(kp, projection_dim, num_jet, num_classes)

    # tolerance is 1e-3: the streamed LayerNorm uses one-pass (E[x^2]-E[x]^2)
    # statistics on the MXU, which is slightly looser than the two-pass reference.
    TOL = 1e-3

    # --- case 1: spec-sized small shapes (single block, packed k=4) ---
    B, S = 2, 8
    x = jax.random.normal(k1, (B, S, projection_dim), jnp.float32)
    jet = jax.random.normal(k2, (B, num_jet), jnp.float32)
    mask = jnp.ones((B, S), jnp.float32)  # unused in simple=True branch
    class_out, reg_out = classifier_head(x, jet, params, mask=mask)
    jax.block_until_ready((class_out, reg_out))
    ref_class, ref_reg = reference(x, jet, params)
    assert class_out.shape == ref_class.shape and reg_out.shape == ref_reg.shape
    assert jnp.allclose(class_out, ref_class, atol=TOL, rtol=TOL)
    assert jnp.allclose(reg_out, ref_reg, atol=TOL, rtol=TOL)

    # --- case 2: exercises >=2 grid steps, batch padding and token padding ---
    B2, S2 = 20, 10
    x2 = jax.random.normal(k3, (B2, S2, projection_dim), jnp.float32)
    jet2 = jax.random.normal(k4, (B2, num_jet), jnp.float32)
    c2, r2 = classifier_head(x2, jet2, params)
    jax.block_until_ready((c2, r2))
    rc2, rr2 = reference(x2, jet2, params)
    assert jnp.allclose(c2, rc2, atol=TOL, rtol=TOL)
    assert jnp.allclose(r2, rr2, atol=TOL, rtol=TOL)

    print("KERNEL_OK")
</pallas_src>

<mosaic_0001>
module attributes {stable_mosaic.version = 11 : i64} {
  func.func @_classifier_head_kernel(%arg0: i32, %arg1: memref<2x8x128xf32, #tpu.memory_space<vmem>>, %arg2: memref<2x4xf32, #tpu.memory_space<vmem>>, %arg3: memref<4x64xf32, #tpu.memory_space<vmem>>, %arg4: memref<1x64xf32, #tpu.memory_space<vmem>>, %arg5: memref<64x32xf32, #tpu.memory_space<vmem>>, %arg6: memref<1x32xf32, #tpu.memory_space<vmem>>, %arg7: memref<1x32xf32, #tpu.memory_space<vmem>>, %arg8: memref<1x32xf32, #tpu.memory_space<vmem>>, %arg9: memref<128x128xf32, #tpu.memory_space<vmem>>, %arg10: memref<128x32xf32, #tpu.memory_space<vmem>>, %arg11: memref<32x256xf32, #tpu.memory_space<vmem>>, %arg12: memref<32x256xf32, #tpu.memory_space<vmem>>, %arg13: memref<1x256xf32, #tpu.memory_space<vmem>>, %arg14: memref<2x256xf32, #tpu.memory_space<vmem>>) attributes {dimension_semantics = [#tpu.dimension_semantics<parallel>], iteration_bounds = array<i64: 1>, scalar_prefetch = 0 : i64, scratch_operands = 0 : i64, tpu.core_type = #tpu.core_type<tc>, window_params = [{transform_indices = @transform_0, window_bounds = array<i64: 2, 8, 128>}, {transform_indices = @transform_1, window_bounds = array<i64: 2, 4>}, {pipeline_mode = #tpu.pipeline_mode<synchronous>, transform_indices = @transform_2, window_bounds = array<i64: 4, 64>}, {pipeline_mode = #tpu.pipeline_mode<synchronous>, transform_indices = @transform_3, window_bounds = array<i64: 1, 64>}, {pipeline_mode = #tpu.pipeline_mode<synchronous>, transform_indices = @transform_4, window_bounds = array<i64: 64, 32>}, {pipeline_mode = #tpu.pipeline_mode<synchronous>, transform_indices = @transform_5, window_bounds = array<i64: 1, 32>}, {pipeline_mode = #tpu.pipeline_mode<synchronous>, transform_indices = @transform_6, window_bounds = array<i64: 1, 32>}, {pipeline_mode = #tpu.pipeline_mode<synchronous>, transform_indices = @transform_7, window_bounds = array<i64: 1, 32>}, {pipeline_mode = #tpu.pipeline_mode<synchronous>, transform_indices = @transform_8, window_bounds = array<i64: 128, 128>}, {pipeline_mode = #tpu.pipeline_mode<synchronous>, transform_indices = @transform_9, window_bounds = array<i64: 128, 32>}, {pipeline_mode = #tpu.pipeline_mode<synchronous>, transform_indices = @transform_10, window_bounds = array<i64: 32, 256>}, {pipeline_mode = #tpu.pipeline_mode<synchronous>, transform_indices = @transform_11, window_bounds = array<i64: 32, 256>}, {pipeline_mode = #tpu.pipeline_mode<synchronous>, transform_indices = @transform_12, window_bounds = array<i64: 1, 256>}, {transform_indices = @transform_13, window_bounds = array<i64: 2, 256>}]} {
    %c0 = arith.constant 0 : index
    %c0_0 = arith.constant 0 : index
    %0 = vector.load %arg2[%c0, %c0_0] : memref<2x4xf32, #tpu.memory_space<vmem>>, vector<2x4xf32>
    %c0_1 = arith.constant 0 : index
    %c0_2 = arith.constant 0 : index
    %1 = vector.load %arg3[%c0_1, %c0_2] : memref<4x64xf32, #tpu.memory_space<vmem>>, vector<4x64xf32>
    %cst = arith.constant dense<0.000000e+00> : vector<2x64xf32>
    %2 = tpu.matmul %0, %1, %cst {dimension_numbers = #tpu.dot_dimension_numbers<[1], [0], [0], [1], [0, 0, 1, 1], [], []>} : vector<2x4xf32>, vector<4x64xf32>, vector<2x64xf32> -> vector<2x64xf32>
    %c0_3 = arith.constant 0 : index
    %c0_4 = arith.constant 0 : index
    %3 = vector.load %arg4[%c0_3, %c0_4] : memref<1x64xf32, #tpu.memory_space<vmem>>, vector<1x64xf32>
    %4 = vector.broadcast %3 : vector<1x64xf32> to vector<2x64xf32>
    %5 = arith.addf %2, %4 : vector<2x64xf32>
    %cst_5 = arith.constant 5.000000e-01 : f32
    %6 = vector.broadcast %cst_5 : f32 to vector<2x64xf32>
    %7 = arith.mulf %6, %5 : vector<2x64xf32>
    %cst_6 = arith.constant 0.707106769 : f32
    %8 = vector.broadcast %cst_6 : f32 to vector<2x64xf32>
    %9 = arith.mulf %5, %8 : vector<2x64xf32>
    %10 = math.erf %9 : vector<2x64xf32>
    %cst_7 = arith.constant 1.000000e+00 : f32
    %11 = vector.broadcast %cst_7 : f32 to vector<2x64xf32>
    %12 = arith.addf %11, %10 : vector<2x64xf32>
    %13 = arith.mulf %7, %12 : vector<2x64xf32>
    %c0_8 = arith.constant 0 : index
    %c0_9 = arith.constant 0 : index
    %14 = vector.load %arg5[%c0_8, %c0_9] : memref<64x32xf32, #tpu.memory_space<vmem>>, vector<64x32xf32>
    %cst_10 = arith.constant dense<0.000000e+00> : vector<2x32xf32>
    %15 = tpu.matmul %13, %14, %cst_10 {dimension_numbers = #tpu.dot_dimension_numbers<[1], [0], [0], [1], [0, 0, 1, 1], [], []>} : vector<2x64xf32>, vector<64x32xf32>, vector<2x32xf32> -> vector<2x32xf32>
    %c0_11 = arith.constant 0 : index
    %c0_12 = arith.constant 0 : index
    %16 = vector.load %arg6[%c0_11, %c0_12] : memref<1x32xf32, #tpu.memory_space<vmem>>, vector<1x32xf32>
    %17 = vector.broadcast %16 : vector<1x32xf32> to vector<2x32xf32>
    %18 = arith.addf %15, %17 : vector<2x32xf32>
    %cst_13 = arith.constant 5.000000e-01 : f32
    %19 = vector.broadcast %cst_13 : f32 to vector<2x32xf32>
    %20 = arith.mulf %19, %18 : vector<2x32xf32>
    %cst_14 = arith.constant 0.707106769 : f32
    %21 = vector.broadcast %cst_14 : f32 to vector<2x32xf32>
    %22 = arith.mulf %18, %21 : vector<2x32xf32>
    %23 = math.erf %22 : vector<2x32xf32>
    %cst_15 = arith.constant 1.000000e+00 : f32
    %24 = vector.broadcast %cst_15 : f32 to vector<2x32xf32>
    %25 = arith.addf %24, %23 : vector<2x32xf32>
    %26 = arith.mulf %20, %25 : vector<2x32xf32>
    %c0_16 = arith.constant 0 : index
    %c0_17 = arith.constant 0 : index
    %27 = vector.load %arg9[%c0_16, %c0_17] : memref<128x128xf32, #tpu.memory_space<vmem>>, vector<128x128xf32>
    %c0_18 = arith.constant 0 : index
    %c0_19 = arith.constant 0 : index
    %c0_20 = arith.constant 0 : index
    %28 = vector.load %arg1[%c0_18, %c0_19, %c0_20] : memref<2x8x128xf32, #tpu.memory_space<vmem>>, vector<2x8x128xf32>
    %29 = vector.shape_cast %28 : vector<2x8x128xf32> to vector<16x128xf32>
    %cst_21 = arith.constant dense<0.000000e+00> : vector<16x128xf32>
    %30 = tpu.matmul %29, %27, %cst_21 {dimension_numbers = #tpu.dot_dimension_numbers<[1], [0], [0], [1], [0, 0, 1, 1], [], []>} : vector<16x128xf32>, vector<128x128xf32>, vector<16x128xf32> -> vector<16x128xf32>
    %31 = arith.mulf %29, %29 : vector<16x128xf32>
    %cst_22 = arith.constant dense<0.000000e+00> : vector<16x128xf32>
    %32 = tpu.matmul %31, %27, %cst_22 {dimension_numbers = #tpu.dot_dimension_numbers<[1], [0], [0], [1], [0, 0, 1, 1], [], []>} : vector<16x128xf32>, vector<128x128xf32>, vector<16x128xf32> -> vector<16x128xf32>
    %cst_23 = arith.constant 3.125000e-02 : f32
    %33 = vector.broadcast %cst_23 : f32 to vector<16x128xf32>
    %34 = arith.mulf %30, %33 : vector<16x128xf32>
    %cst_24 = arith.constant 3.125000e-02 : f32
    %35 = vector.broadcast %cst_24 : f32 to vector<16x128xf32>
    %36 = arith.mulf %32, %35 : vector<16x128xf32>
    %37 = arith.mulf %34, %34 : vector<16x128xf32>
    %38 = arith.subf %36, %37 : vector<16x128xf32>
    %cst_25 = arith.constant 0.000000e+00 : f32
    %39 = vector.broadcast %cst_25 : f32 to vector<16x128xf32>
    %40 = arith.maximumf %38, %39 : vector<16x128xf32>
    %41 = arith.subf %29, %34 : vector<16x128xf32>
    %cst_26 = arith.constant 9.99999974E-6 : f32
    %42 = vector.broadcast %cst_26 : f32 to vector<16x128xf32>
    %43 = arith.addf %40, %42 : vector<16x128xf32>
    %44 = math.rsqrt %43 : vector<16x128xf32>
    %45 = arith.mulf %41, %44 : vector<16x128xf32>
    %46 = vector.shape_cast %45 : vector<16x128xf32> to vector<2x8x128xf32>
    %cst_27 = arith.constant dense<0.000000e+00> : vector<2x128xf32>
    %47 = vector.multi_reduction <add>, %46, %cst_27 [1] : vector<2x8x128xf32> to vector<2x128xf32>
    %c0_28 = arith.constant 0 : index
    %c0_29 = arith.constant 0 : index
    %48 = vector.load %arg10[%c0_28, %c0_29] : memref<128x32xf32, #tpu.memory_space<vmem>>, vector<128x32xf32>
    %cst_30 = arith.constant dense<0.000000e+00> : vector<2x32xf32>
    %49 = tpu.matmul %47, %48, %cst_30 {dimension_numbers = #tpu.dot_dimension_numbers<[1], [0], [0], [1], [0, 0, 1, 1], [], []>} : vector<2x128xf32>, vector<128x32xf32>, vector<2x32xf32> -> vector<2x32xf32>
    %cst_31 = arith.constant 1.250000e-01 : f32
    %50 = vector.broadcast %cst_31 : f32 to vector<2x32xf32>
    %51 = arith.mulf %49, %50 : vector<2x32xf32>
    %52 = arith.addf %51, %26 : vector<2x32xf32>
    %cst_32 = arith.constant dense<0.000000e+00> : vector<2xf32>
    %53 = vector.multi_reduction <add>, %52, %cst_32 [1] : vector<2x32xf32> to vector<2xf32>
    %54 = vector.shape_cast %53 : vector<2xf32> to vector<2x1xf32>
    %cst_33 = arith.constant 3.200000e+01 : f32
    %55 = vector.broadcast %cst_33 : f32 to vector<2x1xf32>
    %56 = arith.divf %54, %55 : vector<2x1xf32>
    %57 = vector.broadcast %56 : vector<2x1xf32> to vector<2x32xf32>
    %58 = arith.subf %52, %57 : vector<2x32xf32>
    %59 = arith.mulf %58, %58 : vector<2x32xf32>
    %cst_34 = arith.constant dense<0.000000e+00> : vector<2xf32>
    %60 = vector.multi_reduction <add>, %59, %cst_34 [1] : vector<2x32xf32> to vector<2xf32>
    %61 = vector.shape_cast %60 : vector<2xf32> to vector<2x1xf32>
    %cst_35 = arith.constant 3.200000e+01 : f32
    %62 = vector.broadcast %cst_35 : f32 to vector<2x1xf32>
    %63 = arith.divf %61, %62 : vector<2x1xf32>
    %64 = vector.broadcast %56 : vector<2x1xf32> to vector<2x32xf32>
    %65 = arith.subf %52, %64 : vector<2x32xf32>
    %cst_36 = arith.constant 9.99999974E-6 : f32
    %66 = vector.broadcast %cst_36 : f32 to vector<2x1xf32>
    %67 = arith.addf %63, %66 : vector<2x1xf32>
    %68 = math.rsqrt %67 : vector<2x1xf32>
    %69 = vector.broadcast %68 : vector<2x1xf32> to vector<2x32xf32>
    %70 = arith.mulf %65, %69 : vector<2x32xf32>
    %c0_37 = arith.constant 0 : index
    %c0_38 = arith.constant 0 : index
    %71 = vector.load %arg7[%c0_37, %c0_38] : memref<1x32xf32, #tpu.memory_space<vmem>>, vector<1x32xf32>
    %72 = vector.broadcast %71 : vector<1x32xf32> to vector<2x32xf32>
    %73 = arith.mulf %70, %72 : vector<2x32xf32>
    %c0_39 = arith.constant 0 : index
    %c0_40 = arith.constant 0 : index
    %74 = vector.load %arg8[%c0_39, %c0_40] : memref<1x32xf32, #tpu.memory_space<vmem>>, vector<1x32xf32>
    %75 = vector.broadcast %74 : vector<1x32xf32> to vector<2x32xf32>
    %76 = arith.addf %73, %75 : vector<2x32xf32>
    %c0_41 = arith.constant 0 : index
    %c0_42 = arith.constant 0 : index
    %77 = vector.load %arg11[%c0_41, %c0_42] : memref<32x256xf32, #tpu.memory_space<vmem>>, vector<32x256xf32>
    %cst_43 = arith.constant dense<0.000000e+00> : vector<2x256xf32>
    %78 = tpu.matmul %76, %77, %cst_43 {dimension_numbers = #tpu.dot_dimension_numbers<[1], [0], [0], [1], [0, 0, 1, 1], [], []>} : vector<2x32xf32>, vector<32x256xf32>, vector<2x256xf32> -> vector<2x256xf32>
    %c0_44 = arith.constant 0 : index
    %c0_45 = arith.constant 0 : index
    %79 = vector.load %arg12[%c0_44, %c0_45] : memref<32x256xf32, #tpu.memory_space<vmem>>, vector<32x256xf32>
    %cst_46 = arith.constant dense<0.000000e+00> : vector<2x256xf32>
    %80 = tpu.matmul %52, %79, %cst_46 {dimension_numbers = #tpu.dot_dimension_numbers<[1], [0], [0], [1], [0, 0, 1, 1], [], []>} : vector<2x32xf32>, vector<32x256xf32>, vector<2x256xf32> -> vector<2x256xf32>
    %81 = arith.addf %78, %80 : vector<2x256xf32>
    %c0_47 = arith.constant 0 : index
    %c0_48 = arith.constant 0 : index
    %82 = vector.load %arg13[%c0_47, %c0_48] : memref<1x256xf32, #tpu.memory_space<vmem>>, vector<1x256xf32>
    %83 = vector.broadcast %82 : vector<1x256xf32> to vector<2x256xf32>
    %84 = arith.addf %81, %83 : vector<2x256xf32>
    %c0_49 = arith.constant 0 : index
    %c0_50 = arith.constant 0 : index
    %85 = vector.load %arg14[%c0_49, %c0_50] : memref<2x256xf32, #tpu.memory_space<vmem>>, vector<2x256xf32>
    tpu.vector_store %arg14[%c0_49, %c0_50], %84 {strides = array<i32>} : memref<2x256xf32, #tpu.memory_space<vmem>>, vector<2x256xf32>,
    return
  }
  func.func @transform_0(%arg0: i32) -> (i32, i32, i32) {
    %c0_i32 = arith.constant 0 : i32
    %c0_i32_0 = arith.constant 0 : i32
    %c0_i32_1 = arith.constant 0 : i32
    return %arg0, %c0_i32, %c0_i32_0 : i32, i32, i32
  }
  func.func @transform_1(%arg0: i32) -> (i32, i32) {
    %c0_i32 = arith.constant 0 : i32
    %c0_i32_0 = arith.constant 0 : i32
    return %arg0, %c0_i32 : i32, i32
  }
  func.func @transform_2(%arg0: i32) -> (i32, i32) {
    %c0_i32 = arith.constant 0 : i32
    %c0_i32_0 = arith.constant 0 : i32
    %c0_i32_1 = arith.constant 0 : i32
    return %c0_i32, %c0_i32_0 : i32, i32
  }
  func.func @transform_3(%arg0: i32) -> (i32, i32) {
    %c0_i32 = arith.constant 0 : i32
    %c0_i32_0 = arith.constant 0 : i32
    %c0_i32_1 = arith.constant 0 : i32
    return %c0_i32, %c0_i32_0 : i32, i32
  }
  func.func @transform_4(%arg0: i32) -> (i32, i32) {
    %c0_i32 = arith.constant 0 : i32
    %c0_i32_0 = arith.constant 0 : i32
    %c0_i32_1 = arith.constant 0 : i32
    return %c0_i32, %c0_i32_0 : i32, i32
  }
  func.func @transform_5(%arg0: i32) -> (i32, i32) {
    %c0_i32 = arith.constant 0 : i32
    %c0_i32_0 = arith.constant 0 : i32
    %c0_i32_1 = arith.constant 0 : i32
    return %c0_i32, %c0_i32_0 : i32, i32
  }
  func.func @transform_6(%arg0: i32) -> (i32, i32) {
    %c0_i32 = arith.constant 0 : i32
    %c0_i32_0 = arith.constant 0 : i32
    %c0_i32_1 = arith.constant 0 : i32
    return %c0_i32, %c0_i32_0 : i32, i32
  }
  func.func @transform_7(%arg0: i32) -> (i32, i32) {
    %c0_i32 = arith.constant 0 : i32
    %c0_i32_0 = arith.constant 0 : i32
    %c0_i32_1 = arith.constant 0 : i32
    return %c0_i32, %c0_i32_0 : i32, i32
  }
  func.func @transform_8(%arg0: i32) -> (i32, i32) {
    %c0_i32 = arith.constant 0 : i32
    %c0_i32_0 = arith.constant 0 : i32
    %c0_i32_1 = arith.constant 0 : i32
    return %c0_i32, %c0_i32_0 : i32, i32
  }
  func.func @transform_9(%arg0: i32) -> (i32, i32) {
    %c0_i32 = arith.constant 0 : i32
    %c0_i32_0 = arith.constant 0 : i32
    %c0_i32_1 = arith.constant 0 : i32
    return %c0_i32, %c0_i32_0 : i32, i32
  }
  func.func @transform_10(%arg0: i32) -> (i32, i32) {
    %c0_i32 = arith.constant 0 : i32
    %c0_i32_0 = arith.constant 0 : i32
    %c0_i32_1 = arith.constant 0 : i32
    return %c0_i32, %c0_i32_0 : i32, i32
  }
  func.func @transform_11(%arg0: i32) -> (i32, i32) {
    %c0_i32 = arith.constant 0 : i32
    %c0_i32_0 = arith.constant 0 : i32
    %c0_i32_1 = arith.constant 0 : i32
    return %c0_i32, %c0_i32_0 : i32, i32
  }
  func.func @transform_12(%arg0: i32) -> (i32, i32) {
    %c0_i32 = arith.constant 0 : i32
    %c0_i32_0 = arith.constant 0 : i32
    %c0_i32_1 = arith.constant 0 : i32
    return %c0_i32, %c0_i32_0 : i32, i32
  }
  func.func @transform_13(%arg0: i32) -> (i32, i32) {
    %c0_i32 = arith.constant 0 : i32
    %c0_i32_0 = arith.constant 0 : i32
    return %arg0, %c0_i32 : i32, i32
  }
}

</mosaic_0001>

<bundles_post_ra>
// kernel: tpu_custom_call.1
= control target key start
LH: loop header
LB: loop body
LE: loop exit
PB: predicated region body
PF: predicated region fallthrough
CT: control target
= control target key end

     0   :  { %18 = vsyncpa [#allocation3], 0  ;;  %s1718_s0 = inlined_call_operand.hbm [shape: f32[2,8,128], index: 0, kind: input, shape index: {}]   ;;  %s1719_s1 = inlined_call_operand.vmem [shape: f32[2,4], index: 1, kind: input, shape index: {}]   ;;  %s1720_s2 = inlined_call_operand.hbm [shape: f32[4,64], index: 2, kind: input, shape index: {}]   ;;  %s1721_s3 = inlined_call_operand.hbm [shape: f32[1,64], index: 3, kind: input, shape index: {}]   ;;  %s1722_s4 = inlined_call_operand.vmem [shape: f32[64,32], index: 4, kind: input, shape index: {}]   ;;  %s1723_s5 = inlined_call_operand.hbm [shape: f32[1,32], index: 5, kind: input, shape index: {}]   ;;  %s1724_s6 = inlined_call_operand.hbm [shape: f32[1,32], index: 6, kind: input, shape index: {}]   ;;  %s1725_s7 = inlined_call_operand.hbm [shape: f32[1,32], index: 7, kind: input, shape index: {}]   ;;  %s1726_s8 = inlined_call_operand.vmem [shape: f32[128,128], index: 8, kind: input, shape index: {}]   ;;  %s1727_s9 = inlined_call_operand.vmem [shape: f32[128,32], index: 9, kind: input, shape index: {}]   ;;  %s1728_s10 = inlined_call_operand.vmem [shape: f32[32,256], index: 10, kind: input, shape index: {}]   ;;  %s1729_s11 = inlined_call_operand.vmem [shape: f32[32,256], index: 11, kind: input, shape index: {}]   ;;  %s1730_s12 = inlined_call_operand.vmem [shape: f32[1,256], index: 12, kind: input, shape index: {}]   ;;  %s1731_s13 = inlined_call_operand.hbm [shape: f32[2,256], index: 13, kind: output, shape index: {}]  }
   0x1   :  { %19 = vsyncpa [#allocation6], 0 }
   0x2   :  { %20 = vsyncpa [#allocation9], 0 }
   0x3   :  { %21 = vsyncpa [#allocation12], 0 }
   0x4   :  { %22 = vsyncpa [#allocation4], 0  ;;  %s1343_s25 = smov [#allocation5]   ;;  %s1344_s27 = smov [#allocation8]  }
   0x5   :  { %s43_s26 = sshll.u32 %s1343_s25, 4  ;;  %s65_s28 = sshll.u32 %s1344_s27, 4  ;;  %s44_s26 = int_to_ptr.vmem [resolvable:$true] %s43_s26  ;;  %s66_s28 = int_to_ptr.vmem [resolvable:$true] %s65_s28 }
   0x6   :  { %s1179_s14 = scalar_lea.hbm %s1720_s2, 64 }
   0x7   :  { %p1180_p0 = scmp.ne.s32.totalorder %s1720_s2, %s1179_s14  ;;  %p1183_p1 = scmp.lt.u32.totalorder %s1179_s14, %s1720_s2 }
   0x9   :  { %p1185_p2 = pnand %p1183_p1, %p1180_p0 }
   0xb   :  { %1188 = shalt.err (!%p1185_p2)
}
   0xc   :  { %s1189_s19 = scalar_lea.vmem %s44_s26, 64  ;;  %p1194_p4 = scmp.lt.s32.totalorder %s44_s26, %s44_s26 }
   0xd   :  { %p1190_p3 = scmp.ne.s32.totalorder %s44_s26, %s1189_s19  ;;  %p1195_p5 = scmp.lt.s32.totalorder %s1189_s19, %s1189_s19 }
   0xf   :  { %p1196_p6 = por %p1195_p5, %p1194_p4 }
  0x11   :  { %p1197_p7 = pnand %p1196_p6, %p1190_p3 }
  0x13   :  { %1200 = shalt.err (!%p1197_p7)
}
  0x14   :  { %46 = dma.hbm_to_vmem [thread:$0]  %s1720_s2, 64, %s44_s26, [#allocation6]  }
  0x15   :  { %s1201_s24 = scalar_lea.hbm %s1723_s5, 16 }
  0x16   :  { %p1202_p8 = scmp.ne.s32.totalorder %s1723_s5, %s1201_s24  ;;  %p1205_p9 = scmp.lt.u32.totalorder %s1201_s24, %s1723_s5 }
  0x18   :  { %p1207_p10 = pnand %p1205_p9, %p1202_p8 }
  0x1a   :  { %1210 = shalt.err (!%p1207_p10)
}
  0x1b   :  { %s1211_s14 = scalar_lea.vmem %s66_s28, 16  ;;  %s1215_s15 = scalar_lea.vmem %s66_s28, 32 }
  0x1c   :  { %p1212_p11 = scmp.ne.s32.totalorder %s66_s28, %s1211_s14  ;;  %p1216_p12 = scmp.lt.s32.totalorder %s66_s28, %s66_s28 }
  0x1d   :  { %p1217_p13 = scmp.lt.s32.totalorder %s1215_s15, %s1211_s14 }
  0x1f   :  { %p1218_p0 = por %p1217_p13, %p1216_p12 }
  0x21   :  { %p1219_p1 = pnand %p1218_p0, %p1212_p11 }
  0x23   :  { %1222 = shalt.err (!%p1219_p1)
}
  0x24   :  { %68 = dma.hbm_to_vmem [thread:$0]  %s1723_s5, 16, %s66_s28, [#allocation9]  }
  0x25   :  { %s1345_s16 = smov [#allocation2]   ;;  %s1223_s20 = scalar_lea.hbm %s1718_s0, 256 }
  0x26   :  { %s28_s17 = sshll.u32 %s1345_s16, 4  ;;  %p1224_p2 = scmp.ne.s32.totalorder %s1718_s0, %s1223_s20  ;;  %s29_s17 = int_to_ptr.vmem [resolvable:$true] %s28_s17 }
  0x27   :  { %p1227_p3 = scmp.lt.u32.totalorder %s1223_s20, %s1718_s0 }
  0x29   :  { %p1229_p4 = pnand %p1227_p3, %p1224_p2 }
  0x2b   :  { %1232 = shalt.err (!%p1229_p4)
}
  0x2c   :  { %s1233_s25 = scalar_lea.vmem %s29_s17, 256  ;;  %p1238_p6 = scmp.lt.s32.totalorder %s29_s17, %s29_s17 }
  0x2d   :  { %p1234_p5 = scmp.ne.s32.totalorder %s29_s17, %s1233_s25  ;;  %p1239_p7 = scmp.lt.s32.totalorder %s1233_s25, %s1233_s25 }
  0x2f   :  { %p1240_p8 = por %p1239_p7, %p1238_p6 }
  0x31   :  { %p1241_p9 = pnand %p1240_p8, %p1234_p5 }
  0x33   :  { %1244 = shalt.err (!%p1241_p9)
}
  0x34   :  { %s1346_s5 = smov 128   ;;  %s1347_s28 = smov 8  }
  0x35   :  { %34 = dma.hbm_to_vmem [thread:$0]  %s1718_s0, 256, %s29_s17, [#allocation3], %s1346_s5, %s1346_s5, %s1347_s28  }
  0x36   :  { %s1348_s30 = smov [#allocation7]   ;;  %s1349_s15 = smov [#allocation10]  }
  0x37   :  { %s53_s14 = sshll.u32 %s1348_s30, 4  ;;  %s75_s2 = sshll.u32 %s1349_s15, 4  ;;  %s54_s14 = int_to_ptr.vmem [resolvable:$true] %s53_s14  ;;  %s76_s2 = int_to_ptr.vmem [resolvable:$true] %s75_s2 }
  0x38   :  { %s1245_s18 = scalar_lea.hbm %s1721_s3, 16 }
  0x39   :  { %p1246_p10 = scmp.ne.s32.totalorder %s1721_s3, %s1245_s18  ;;  %p1249_p11 = scmp.lt.u32.totalorder %s1245_s18, %s1721_s3 }
  0x3b   :  { %p1251_p12 = pnand %p1249_p11, %p1246_p10 }
  0x3d   :  { %1254 = shalt.err (!%p1251_p12)
}
  0x3e   :  { %s1255_s0 = scalar_lea.vmem %s54_s14, 16  ;;  %s1259_s17 = scalar_lea.vmem %s54_s14, 32 }
  0x3f   :  { %p1256_p13 = scmp.ne.s32.totalorder %s54_s14, %s1255_s0  ;;  %p1260_p0 = scmp.lt.s32.totalorder %s54_s14, %s54_s14 }
  0x40   :  { %p1261_p1 = scmp.lt.s32.totalorder %s1259_s17, %s1255_s0 }
  0x42   :  { %p1262_p2 = por %p1261_p1, %p1260_p0 }
  0x44   :  { %p1263_p3 = pnand %p1262_p2, %p1256_p13 }
  0x46   :  { %1266 = shalt.err (!%p1263_p3)
}
  0x47   :  { %56 = dma.hbm_to_vmem [thread:$0]  %s1721_s3, 16, %s54_s14, [#allocation6]  }
  0x48   :  { %s1267_s28 = scalar_lea.hbm %s1724_s6, 16 }
  0x49   :  { %p1268_p4 = scmp.ne.s32.totalorder %s1724_s6, %s1267_s28  ;;  %p1271_p5 = scmp.lt.u32.totalorder %s1267_s28, %s1724_s6 }
  0x4b   :  { %p1273_p6 = pnand %p1271_p5, %p1268_p4 }
  0x4d   :  { %1276 = shalt.err (!%p1273_p6)
}
  0x4e   :  { %s1277_s26 = scalar_lea.vmem %s76_s2, 16  ;;  %s1281_s16 = scalar_lea.vmem %s76_s2, 32 }
  0x4f   :  { %p1278_p7 = scmp.ne.s32.totalorder %s76_s2, %s1277_s26  ;;  %p1282_p8 = scmp.lt.s32.totalorder %s76_s2, %s76_s2 }
  0x50   :  { %p1283_p9 = scmp.lt.s32.totalorder %s1281_s16, %s1277_s26 }
  0x52   :  { %p1284_p10 = por %p1283_p9, %p1282_p8 }
  0x54   :  { %p1285_p11 = pnand %p1284_p10, %p1278_p7 }
  0x56   :  { %1288 = shalt.err (!%p1285_p11)
}
  0x57   :  { %78 = dma.hbm_to_vmem [thread:$0]  %s1724_s6, 16, %s76_s2, [#allocation9]  }
  0x58   :  { %s1350_s18 = smov [#allocation11]   ;;  %s1289_s22 = scalar_lea.hbm %s1725_s7, 16 }
  0x59   :  { %s85_s19 = sshll.u32 %s1350_s18, 4  ;;  %p1290_p12 = scmp.ne.s32.totalorder %s1725_s7, %s1289_s22  ;;  %s86_s19 = int_to_ptr.vmem [resolvable:$true] %s85_s19 }
  0x5a   :  { %p1293_p13 = scmp.lt.u32.totalorder %s1289_s22, %s1725_s7 }
  0x5c   :  { %p1295_p0 = pnand %p1293_p13, %p1290_p12 }
  0x5e   :  { %1298 = shalt.err (!%p1295_p0)
}
  0x5f   :  { %s1299_s25 = scalar_lea.vmem %s86_s19, 16  ;;  %s1303_s6 = scalar_lea.vmem %s86_s19, 32 }
  0x60   :  { %p1300_p1 = scmp.ne.s32.totalorder %s86_s19, %s1299_s25  ;;  %p1304_p2 = scmp.lt.s32.totalorder %s86_s19, %s86_s19 }
  0x61   :  { %p1305_p3 = scmp.lt.s32.totalorder %s1303_s6, %s1299_s25 }
  0x63   :  { %p1306_p4 = por %p1305_p3, %p1304_p2 }
  0x65   :  { %p1307_p5 = pnand %p1306_p4, %p1300_p1 }
  0x67   :  { %1310 = shalt.err (!%p1307_p5)
}
  0x68   :  { %88 = dma.hbm_to_vmem [thread:$0]  %s1725_s7, 16, %s86_s19, [#allocation12]  }
  0x69   :  { %1333 = dma.done.wait [#allocation3], 256  }
  0x6a   :  { %1334 = vsyncadd [#allocation3], 4294967040 }
  0x6b   :  { %1335 = dma.done.wait [#allocation6], 80  }
  0x6c   :  { %1336 = vsyncadd [#allocation6], 4294967216 }
  0x6d   :  { %1337 = dma.done.wait [#allocation9], 32  }
  0x6e   :  { %1338 = vsyncadd [#allocation9], 4294967264 }
  0x6f   :  { %1339 = dma.done.wait [#allocation12], 16  }
  0x70   :  { %1340 = vsyncadd [#allocation12], 4294967280  ;;  %v1351_v0 = vmov 0.0   ;;  %vm1352_vm0 = vmmov 0   ;;  %vm130_vm1 = vcmask 1043456   ;;  %vm126_vm2 = vcmask 31744  }
  0x71   :  { %910 = vmatprep.subr.mxu0 %v1351_v0  ;;  %912 = vmatprep.mubr.msk.f32.mxu0 %vm1352_vm0, %v1351_v0  ;;  %v118_v1 = vld [vmem:[#allocation5] sm:$0xf]  ;;  %v117_v2 = vld [vmem:[%s1719_s1] sm:$0x3]  ;;  %v210_v4 = vld [vmem:[%s1722_s4 + $0x8] sm:$0xff]  ;;  %v1353_v6 = vmov 0.0|0.0  }
  0x72   :  { %931 = vmatprep.mubr.msk.f32.mxu1 %vm1352_vm0, %v1351_v0  ;;  %911 = vmatpush3.msk.msra.mxu0 %vm130_vm1, %v118_v1  ;;  %v209_v3 = vld [vmem:[%s1722_s4] sm:$0xff]  ;;  %v211_v7 = vld [vmem:[%s1722_s4 + $0x10] sm:$0xff]  ;;  %v212_v8 = vld [vmem:[%s1722_s4 + $0x18] sm:$0xff]  ;;  %vm224_vm3 = vcmask 523264   ;;  %vm521_vm4 = vcmask 1041409   ;;  %vm643_vm5 = vcmask 261120  }
  0x73   :  { %913 = vmatmul.mubr.msk.f32.vlgmr.msra.gmra.mrb[0].mxu0 %vm126_vm2, %v117_v2  ;;  %v1040_v5 = vpack.c.bf16 %v210_v4, %v209_v3  ;;  %1039 = vmatprep.subr.bf16.mxu1 %v1353_v6  ;;  %v1043_v9 = vpack.c.bf16 %v212_v8, %v211_v7  ;;  %v213_v10 = vld [vmem:[%s1722_s4 + $0x20] sm:$0xff]  ;;  %v214_v11 = vld [vmem:[%s1722_s4 + $0x28] sm:$0xff]  ;;  %v215_v13 = vld [vmem:[%s1722_s4 + $0x30] sm:$0xff]  ;;  %vm596_vm6 = vcmask 254976   ;;  %s1354_s14 = smov [#allocation13]  }
  0x74   :  { %v1046_v12 = vpack.c.bf16 %v214_v11, %v213_v10  ;;  %v216_v14 = vld [vmem:[%s1722_s4 + $0x38] sm:$0xff]  ;;  %v303_v15 = vld [vmem:[%s1726_s8] sm:$0xff]  ;;  %v304_v17 = vld [vmem:[%s1726_s8 + $0x8] sm:$0xff]  ;;  %s824_s18 = sshll.u32 %s1354_s14, 4  ;;  %s825_s18 = int_to_ptr.vmem [resolvable:$true] %s824_s18 }
  0x75   :  { %1041 = vmatpush3.bf16.msra.mxu1 %v1040_v5  ;;  %v1049_v16 = vpack.c.bf16 %v216_v14, %v215_v13  ;;  %v1051_v18 = vpack.c.bf16 %v304_v17, %v303_v15  ;;  %v305_v19 = vld [vmem:[%s1726_s8 + $0x10] sm:$0xff]  ;;  %v306_v20 = vld [vmem:[%s1726_s8 + $0x18] sm:$0xff]  ;;  %v307_v22 = vld [vmem:[%s1726_s8 + $0x20] sm:$0xff]  ;;  %p1316_p7 = scmp.lt.s32.totalorder %s825_s18, %s825_s18 }
  0x76   :  { %1042 = vmatprep.subr.bf16.mxu1 %v1353_v6  ;;  %v1055_v21 = vpack.c.bf16 %v306_v20, %v305_v19  ;;  %v308_v23 = vld [vmem:[%s1726_s8 + $0x28] sm:$0xff]  ;;  %v309_v25 = vld [vmem:[%s1726_s8 + $0x30] sm:$0xff]  ;;  %v310_v26 = vld [vmem:[%s1726_s8 + $0x38] sm:$0xff] }
  0x77   :  { %1052 = vmatprep.subr.bf16.mxu0 %v1051_v18  ;;  %v1059_v24 = vpack.c.bf16 %v308_v23, %v307_v22  ;;  %v1063_v27 = vpack.c.bf16 %v310_v26, %v309_v25  ;;  %v311_v28 = vld [vmem:[%s1726_s8 + $0x40] sm:$0xff]  ;;  %v312_v29 = vld [vmem:[%s1726_s8 + $0x48] sm:$0xff]  ;;  %v313_v31 = vld [vmem:[%s1726_s8 + $0x50] sm:$0xff] }
  0x78   :  { %1054 = vmatpush3.bf16.msra.mxu0 %v1051_v18  ;;  %v1067_v30 = vpack.c.bf16 %v312_v29, %v311_v28  ;;  %v314_v32 = vld [vmem:[%s1726_s8 + $0x58] sm:$0xff]  ;;  %v315_v34 = vld [vmem:[%s1726_s8 + $0x60] sm:$0xff]  ;;  %v316_v35 = vld [vmem:[%s1726_s8 + $0x68] sm:$0xff] }
  0x79   :  { %1044 = vmatpush3.bf16.msra.mxu1 %v1043_v9  ;;  %1056 = vmatprep.subr.bf16.mxu0 %v1055_v21  ;;  %v1071_v33 = vpack.c.bf16 %v314_v32, %v313_v31  ;;  %v1075_v36 = vpack.c.bf16 %v316_v35, %v315_v34  ;;  %v317_v37 = vld [vmem:[%s1726_s8 + $0x70] sm:$0xff]  ;;  %v318_v38 = vld [vmem:[%s1726_s8 + $0x78] sm:$0xff]  ;;  %v1581_v40 = vld [vmem:[#allocation2] sm:$0xff] }
  0x7a   :  { %1045 = vmatprep.subr.bf16.mxu1 %v1353_v6  ;;  %v1079_v39 = vpack.c.bf16 %v318_v38, %v317_v37  ;;  %966 = vmatprep.mubr.f32.mxu0 %v1581_v40  ;;  %v1584_v41 = vld [vmem:[#allocation2 + $0x8] sm:$0xff]  ;;  %v836_v42 = vld [vmem:[#allocation7] ss:$0 sm:$0xff]  ;;  %v396_v50 = vmul.f32 %v1581_v40, %v1581_v40  ;;  %v503_v55 = vld [vmem:[%s1727_s9] sm:$0xff] }
  0x7b   :  { %v397_v52 = vmul.f32 %v1584_v41, %v1584_v41  ;;  %v504_v56 = vld [vmem:[%s1727_s9 + $0x8] sm:$0xff]  ;;  %v505_v58 = vld [vmem:[%s1727_s9 + $0x10] sm:$0xff]  ;;  %v506_v59 = vld [vmem:[%s1727_s9 + $0x18] sm:$0xff] }
  0x7c   :  { %1058 = vmatpush3.bf16.msra.mxu0 %v1055_v21  ;;  %v1116_v57 = vpack.c.bf16 %v504_v56, %v503_v55  ;;  %v1119_v60 = vpack.c.bf16 %v506_v59, %v505_v58  ;;  %v507_v61 = vld [vmem:[%s1727_s9 + $0x20] sm:$0xff]  ;;  %v508_v62 = vld [vmem:[%s1727_s9 + $0x28] sm:$0xff]  ;;  %v509_v63 = vld [vmem:[%s1727_s9 + $0x30] sm:$0xff] }
  0x7d   :  { %1047 = vmatpush3.bf16.msra.mxu1 %v1046_v12  ;;  %1060 = vmatprep.subr.bf16.mxu0 %v1059_v24  ;;  %v1122_v1 = vpack.c.bf16 %v508_v62, %v507_v61  ;;  %v510_v2 = vld [vmem:[%s1727_s9 + $0x38] sm:$0xff]  ;;  %v511_v4 = vld [vmem:[%s1727_s9 + $0x40] sm:$0xff]  ;;  %v512_v5 = vld [vmem:[%s1727_s9 + $0x48] sm:$0xff] }
  0x7e   :  { %1048 = vmatprep.subr.bf16.mxu1 %v1353_v6  ;;  %v1125_v3 = vpack.c.bf16 %v510_v2, %v509_v63  ;;  %v1128_v7 = vpack.c.bf16 %v512_v5, %v511_v4  ;;  %v513_v8 = vld [vmem:[%s1727_s9 + $0x50] sm:$0xff]  ;;  %v514_v9 = vld [vmem:[%s1727_s9 + $0x58] sm:$0xff]  ;;  %v515_v11 = vld [vmem:[%s1727_s9 + $0x60] sm:$0xff] }
  0x7f   :  { %v1131_v10 = vpack.c.bf16 %v514_v9, %v513_v8  ;;  %v516_v12 = vld [vmem:[%s1727_s9 + $0x68] sm:$0xff]  ;;  %v517_v14 = vld [vmem:[%s1727_s9 + $0x70] sm:$0xff]  ;;  %v518_v15 = vld [vmem:[%s1727_s9 + $0x78] sm:$0xff]  ;;  %s1311_s9 = scalar_lea.vmem %s825_s18, 64 }
  0x80   :  { %1062 = vmatpush3.bf16.msra.mxu0 %v1059_v24  ;;  %v1134_v13 = vpack.c.bf16 %v516_v12, %v515_v11  ;;  %v636_v17 = vld [vmem:[%s1729_s11 + $0x8] sm:$0xff]  ;;  %v635_v19 = vld [vmem:[%s1729_s11] sm:$0xff]  ;;  %v642_v58 = vld [vmem:[%s1729_s11 + $0x38] sm:$0xff]  ;;  %p1312_p6 = scmp.ne.s32.totalorder %s825_s18, %s1311_s9  ;;  %p1317_p8 = scmp.lt.s32.totalorder %s1311_s9, %s1311_s9 }
  0x81   :  { %1050 = vmatpush3.bf16.msra.mxu1 %v1049_v16  ;;  %1064 = vmatprep.subr.bf16.mxu0 %v1063_v27  ;;  %v1137_v16 = vpack.c.bf16 %v518_v15, %v517_v14  ;;  %v641_v61 = vld [vmem:[%s1729_s11 + $0x30] sm:$0xff] }
  0x82   :  { %1084 = vmatprep.subr.bf16.mxu1 %v1051_v18  ;;  %v839_v63 = vld [vmem:[#allocation8] ss:$0 sm:$0xff]  ;;  %p1318_p9 = por %p1317_p8, %p1316_p7 }
  0x84   :  { %1066 = vmatpush3.bf16.msra.mxu0 %v1063_v27  ;;  %p1319_p10 = pnand %p1318_p9, %p1312_p6 }
  0x85   :  { %1068 = vmatprep.subr.bf16.mxu0 %v1067_v30 }
  0x88   :  { %1070 = vmatpush3.bf16.msra.mxu0 %v1067_v30 }
  0x89   :  { %1072 = vmatprep.subr.bf16.mxu0 %v1071_v33 }
  0x8c   :  { %1074 = vmatpush3.bf16.msra.mxu0 %v1071_v33 }
  0x8d   :  { %1076 = vmatprep.subr.bf16.mxu0 %v1075_v36 }
  0x90   :  { %1078 = vmatpush3.bf16.msra.mxu0 %v1075_v36 }
  0x91   :  { %1080 = vmatprep.subr.bf16.mxu0 %v1079_v39 }
  0x94   :  { %1082 = vmatpush3.bf16.msra.mxu0 %v1079_v39 }
  0x95   :  { %1115 = vmatprep.subr.bf16.mxu0 %v1353_v6 }
  0x97   :  { %967 = vmatmul.mubr.f32.vlgmr.msra.gmra.mrb[2].mxu0 %v1584_v41 }
  0x98   :  { %1036 = vmatprep.mubr.msk.f32.mxu0 %vm1352_vm0, %v1351_v0  ;;  %1117 = vmatpush3.bf16.msra.mxu0 %v1116_v57 }
  0x99   :  { %1118 = vmatprep.subr.bf16.mxu0 %v1353_v6 }
  0x9c   :  { %1120 = vmatpush3.bf16.msra.mxu0 %v1119_v60  ;;  %v639_v60 = vld [vmem:[%s1729_s11 + $0x20] sm:$0xff] }
  0x9d   :  { %1121 = vmatprep.subr.bf16.mxu0 %v1353_v6  ;;  %v1145_v62 = vpack.c.bf16 %v641_v61, %v639_v60 }
  0xa0   :  { %1123 = vmatpush3.bf16.msra.mxu0 %v1122_v1 }
  0xa1   :  { %1124 = vmatprep.subr.bf16.mxu0 %v1353_v6 }
  0xa4   :  { %1126 = vmatpush3.bf16.msra.mxu0 %v1125_v3 }
  0xa5   :  { %1127 = vmatprep.subr.bf16.mxu0 %v1353_v6 }
  0xa8   :  { %1129 = vmatpush3.bf16.msra.mxu0 %v1128_v7 }
  0xa9   :  { %1130 = vmatprep.subr.bf16.mxu0 %v1353_v6 }
  0xac   :  { %1132 = vmatpush3.bf16.msra.mxu0 %v1131_v10 }
  0xad   :  { %1133 = vmatprep.subr.bf16.mxu0 %v1353_v6 }
  0xb0   :  { %1135 = vmatpush3.bf16.msra.mxu0 %v1134_v13 }
  0xb1   :  { %1136 = vmatprep.subr.bf16.mxu0 %v1353_v6 }
  0xb4   :  { %1138 = vmatpush3.bf16.msra.mxu0 %v1137_v16 }
 0x146   :  { %v200_v43 = vpop.f32.mrb[0].mxu0 }
 0x147   :  { %v201_v44 = vadd.f32 %v836_v42, %v200_v43  ;;  %v914_v45 = vpop.f32.mrb[1].mxu0 }
 0x149   :  { %v205_v46 = vmul.f32 0.70710677, %v201_v44  ;;  %v204_v48 = vmul.f32 0.5, %v201_v44 }
 0x14b   :  { %1169 = verf.f32 %v205_v46 }
 0x155   :  { %v1170_v47 = vpop.eup %1169 }
 0x156   :  { %v207_v49 = vadd.f32 1.0, %v1170_v47 }
 0x158   :  { %v208_v51 = vmul.f32 %v207_v49, %v204_v48 }
 0x15a   :  { %932 = vmatmul.mubr.msk.f32.vlgmr.msra.gmra.mrb[0].mxu1 %vm224_vm3, %v208_v51 }
 0x15b   :  { %1086 = vmatpush3.bf16.msra.mxu1 %v1051_v18  ;;  %1001 = vmatprep.mubr.f32.mxu1 %v396_v50  ;;  %v638_v18 = vld [vmem:[%s1729_s11 + $0x18] sm:$0xff] }
 0x15c   :  { %1088 = vmatprep.subr.bf16.mxu1 %v1055_v21  ;;  %v1139_v20 = vpack.c.bf16 %v638_v18, %v636_v17  ;;  %v628_v18 = vld [vmem:[%s1728_s10 + $0x8] sm:$0xff] }
 0x15f   :  { %1090 = vmatpush3.bf16.msra.mxu1 %v1055_v21  ;;  %v637_v21 = vld [vmem:[%s1729_s11 + $0x10] sm:$0xff] }
 0x160   :  { %1092 = vmatprep.subr.bf16.mxu1 %v1059_v24  ;;  %v1141_v22 = vpack.c.bf16 %v637_v21, %v635_v19  ;;  %v630_v19 = vld [vmem:[%s1728_s10 + $0x18] sm:$0xff]  ;;  %v627_v21 = vld [vmem:[%s1728_s10] sm:$0xff] }
 0x163   :  { %1094 = vmatpush3.bf16.msra.mxu1 %v1059_v24 }
 0x164   :  { %1096 = vmatprep.subr.bf16.mxu1 %v1063_v27 }
 0x167   :  { %1098 = vmatpush3.bf16.msra.mxu1 %v1063_v27 }
 0x168   :  { %1100 = vmatprep.subr.bf16.mxu1 %v1067_v30 }
 0x16a   :  { %v968_v53 = vpop.f32.mrb[2].mxu0 }
 0x16b   :  { %1102 = vmatpush3.bf16.msra.mxu1 %v1067_v30  ;;  %v387_v54 = vpop.f32.mrb[3].mxu0  ;;  %v474_v24 = vmul.f32 0.03125, %v968_v53 }
 0x16c   :  { %1104 = vmatprep.subr.bf16.mxu1 %v1071_v33  ;;  %v473_v25 = vmul.f32 0.03125, %v387_v54 }
 0x16d   :  { %v478_v26 = vmul.f32 %v474_v24, %v474_v24  ;;  %v484_v38 = vsub.f32 %v1584_v41, %v474_v24 }
 0x16e   :  { %v477_v27 = vmul.f32 %v473_v25, %v473_v25  ;;  %v483_v42 = vsub.f32 %v1581_v40, %v473_v25  ;;  %v640_v40 = vld [vmem:[%s1729_s11 + $0x28] sm:$0xff]  ;;  %v631_v25 = vld [vmem:[%s1728_s10 + $0x20] sm:$0xff] }
 0x16f   :  { %1106 = vmatpush3.bf16.msra.mxu1 %v1071_v33  ;;  %v1143_v59 = vpack.c.bf16 %v642_v58, %v640_v40 }
 0x170   :  { %1108 = vmatprep.subr.bf16.mxu1 %v1075_v36 }
 0x173   :  { %1110 = vmatpush3.bf16.msra.mxu1 %v1075_v36 }
 0x174   :  { %1112 = vmatprep.subr.bf16.mxu1 %v1079_v39 }
 0x177   :  { %1114 = vmatpush3.bf16.msra.mxu1 %v1079_v39 }
 0x178   :  { %1140 = vmatprep.subr.bf16.mxu1 %v1139_v20  ;;  %v1147_v20 = vpack.c.bf16 %v630_v19, %v628_v18 }
 0x17a   :  { %1002 = vmatmul.mubr.f32.vlgmr.msra.gmra.mrb[2].mxu1 %v397_v52 }
 0x17b   :  { %711 = vmatprep.mubr.f32.mxu1 %v1351_v0  ;;  %1142 = vmatpush1.bf16.msra.mxu1 %v1141_v22 }
 0x17c   :  { %1144 = vmatprep.subr.bf16.mxu1 %v1143_v59 }
 0x17f   :  { %1146 = vmatpush1.bf16.msra.mxu1 %v1145_v62 }
 0x180   :  { %1148 = vmatprep.subr.bf16.mxu1 %v1147_v20 }
 0x22d   :  { %v294_v6 = vpop.f32.mrb[0].mxu1 }
 0x22e   :  { %v933_v23 = vpop.f32.mrb[1].mxu1  ;;  %v295_v1 = vadd.f32 %v839_v63, %v294_v6  ;;  %v632_v6 = vld [vmem:[%s1728_s10 + $0x28] sm:$0xff] }
 0x22f   :  { %v634_v23 = vld [vmem:[%s1728_s10 + $0x38] sm:$0xff] }
 0x230   :  { %v299_v2 = vmul.f32 0.70710677, %v295_v1  ;;  %v298_v5 = vmul.f32 0.5, %v295_v1  ;;  %v1151_v24 = vpack.c.bf16 %v634_v23, %v632_v6 }
 0x24d   :  { %v1003_v28 = vpop.f32.mrb[2].mxu1 }
 0x24e   :  { %v476_v29 = vmul.f32 0.03125, %v1003_v28  ;;  %v464_v30 = vpop.f32.mrb[3].mxu1 }
 0x24f   :  { %v475_v31 = vmul.f32 0.03125, %v464_v30 }
 0x250   :  { %v480_v32 = vsub.f32 %v476_v29, %v478_v26  ;;  %v633_v26 = vld [vmem:[%s1728_s10 + $0x30] sm:$0xff] }
 0x251   :  { %v479_v33 = vsub.f32 %v475_v31, %v477_v27  ;;  %v1153_v27 = vpack.c.bf16 %v633_v26, %v631_v25 }
 0x252   :  { %v482_v34 = vmax.f32 %v480_v32, 0.0  ;;  %v841_v32 = vld [vmem:[#allocation10] ss:$0 sm:$0xff] }
 0x253   :  { %v481_v35 = vmax.f32 %v479_v33, 0.0 }
 0x254   :  { %v486_v36 = vadd.f32 1e-05, %v482_v34  ;;  %v842_v34 = vld [vmem:[#allocation11] ss:$0 sm:$0xff] }
 0x255   :  { %v485_v37 = vadd.f32 1e-05, %v481_v35 }
 0x256   :  { %1171 = vrsqrt.f32 %v486_v36 }
 0x257   :  { %1173 = vrsqrt.f32 %v485_v37  ;;  %v794_v37 = vlaneseq }
 0x258   :  { %1175 = verf.f32 %v299_v2 }
 0x260   :  { %v1172_v39 = vpop.eup %1171 }
 0x261   :  { %v1174_v43 = vpop.eup %1173  ;;  %v490_v44 = vmul.f32 %v1172_v39, %v484_v38  ;;  %v795_v38 = vshrl.u32 %v794_v37, 7 }
 0x262   :  { %v489_v45 = vmul.f32 %v1174_v43, %v483_v42  ;;  %v1176_v3 = vpop.eup %1175  ;;  %v792_v42 = vld [vmem:[%s1730_s12] sm:$0x3] }
 0x263   :  { %v497_v46 = vrot.slane %v490_v44, 4  ;;  %v301_v4 = vadd.f32 1.0, %v1176_v3  ;;  %v796_v39 = vsub.s32 0, %v795_v38  ;;  %v800_v43 = vsub.s32 1, %v795_v38 }
 0x264   :  { %v491_v47 = vrot.slane %v489_v45, 4 }
 0x265   :  { %v498_v48 = vadd.f32 %v497_v46, %v490_v44  ;;  %v302_v8 = vmul.f32 %v301_v4, %v298_v5  ;;  %v797_v44 = vrot.slane %v792_v42, %v796_v39 }
 0x266   :  { %v492_v49 = vadd.f32 %v491_v47, %v489_v45  ;;  %v801_v45 = vrot.slane %v792_v42, %v800_v43 }
 0x267   :  { %v499_v50 = vrot.slane %v498_v48, 2 }
 0x268   :  { %v493_v51 = vrot.slane %v492_v49, 2 }
 0x269   :  { %v500_v52 = vadd.f32 %v499_v50, %v498_v48 }
 0x26a   :  { %v494_v53 = vadd.f32 %v493_v51, %v492_v49 }
 0x26b   :  { %v501_v54 = vrot.slane %v500_v52, 1 }
 0x26c   :  { %v495_v55 = vrot.slane %v494_v53, 1 }
 0x26d   :  { %v502_v56 = vadd.f32 %v501_v54, %v500_v52 }
 0x26e   :  { %v496_v57 = vadd.f32 %v495_v55, %v494_v53 }
 0x270   :  { %v522_v41 = vsel %vm521_vm4, %v502_v56, %v496_v57 }
 0x271   :  { %1037 = vmatmul.mubr.f32.vlgmr.msra.gmra.mrb[4].mxu0 %v522_v41 }
 0x344   :  { %v590_v7 = vpop.f32.mrb[4].mxu0 }
 0x345   :  { %v594_v9 = vmul.f32 0.125, %v590_v7  ;;  %v1038_v10 = vpop.f32.mrb[5].mxu0 }
 0x347   :  { %v595_v11 = vadd.f32 %v594_v9, %v302_v8 }
 0x349   :  { %843 = vmatmul.mubr.msk.f32.vlgmr.msra.gmra.mrb[4].mxu1 %vm643_vm5, %v595_v11  ;;  %v597_v12 = vsel %vm596_vm6, %v595_v11, 0.0 }
 0x34a   :  { %598 = vadd.xlane.f32.xlu0 %v597_v12  ;;  %785 = vmatprep.mubr.f32.mxu1 %v1351_v0  ;;  %v629_v0 = vld [vmem:[%s1728_s10 + $0x10] sm:$0xff] }
 0x34b   :  { %v1149_v22 = vpack.c.bf16 %v629_v0, %v627_v21 }
 0x34d   :  { %1150 = vmatpush1.bf16.msra.mxu1 %v1149_v22 }
 0x34e   :  { %1152 = vmatprep.subr.bf16.mxu1 %v1151_v24 }
 0x351   :  { %1154 = vmatpush1.bf16.msra.mxu1 %v1153_v27 }
 0x3d7   :  { %v599_v13 = vpop.xlane.xlu0 %598 }
 0x3d8   :  { %v601_v14 = vmul.f32 0.03125, %v599_v13 }
 0x3da   :  { %v602_v15 = vsub.f32 %v595_v11, %v601_v14 }
 0x3dc   :  { %v603_v16 = vmul.f32 %v602_v15, %v602_v15 }
 0x3de   :  { %v604_v17 = vsel %vm596_vm6, %v603_v16, 0.0 }
 0x3df   :  { %605 = vadd.xlane.f32.xlu0 %v604_v17 }
 0x46c   :  { %v606_v28 = vpop.xlane.xlu0 %605 }
 0x46d   :  { %v607_v29 = vmul.f32 0.03125, %v606_v28 }
 0x46f   :  { %v608_v30 = vadd.f32 1e-05, %v607_v29 }
 0x471   :  { %1177 = vrsqrt.f32 %v608_v30 }
 0x47b   :  { %v1178_v31 = vpop.eup %1177 }
 0x47c   :  { %v610_v33 = vmul.f32 %v1178_v31, %v602_v15 }
 0x47e   :  { %v618_v35 = vmul.f32 %v841_v32, %v610_v33 }
 0x480   :  { %v626_v36 = vadd.f32 %v842_v34, %v618_v35 }
 0x482   :  { %844 = vmatmul.mubr.msk.f32.vlgmr.msra.gmra.mrb[4].mxu1 %vm643_vm5, %v626_v36 }
 0x555   :  { %v787_v46 = vpop.f32.mrb[4].mxu1 }
 0x556   :  { %v804_v47 = vadd.f32 %v797_v44, %v787_v46  ;;  %v789_v48 = vpop.f32.mrb[5].mxu1 }
 0x557   :  { %v805_v49 = vadd.f32 %v801_v45, %v789_v48 }
 0x559   :  { %v808_v50 = vcombine.low %v804_v47, %v805_v49 }
 0x55b   :  { %845 = vst.sshfl [vmem:[#allocation13] sm:$0x33 pattern:$0x76325410] %v808_v50 }
 0x55c   :  { %1322 = shalt.err (!%p1319_p10)
}
 0x55d   :  { %s1323_s20 = scalar_lea.hbm %s1731_s13, 64 }
 0x55e   :  { %p1324_p11 = scmp.ne.s32.totalorder %s1731_s13, %s1323_s20  ;;  %p1327_p12 = scmp.lt.u32.totalorder %s1323_s20, %s1731_s13 }
 0x560   :  { %p1329_p13 = pnand %p1327_p12, %p1324_p11 }
 0x562   :  { %1332 = shalt.err (!%p1329_p13)
}
 0x563   :  { %827 = dma.vmem_to_hbm [thread:$0]  %s825_s18, 64, %s1731_s13, [#allocation4]  }
 0x564   :  { %1341 = dma.done.wait [#allocation4], 64  }
 0x565   :  { %1342 = vsyncadd [#allocation4], 4294967232 }
 0x566   :  { %831 = vsyncpa [#allocation3], 1 }
 0x567   :  { %832 = vsyncpa [#allocation6], 1 }
 0x568   :  { %833 = vsyncpa [#allocation9], 1 }
 0x569   :  { %834 = vsyncpa [#allocation12], 1 }
 0x56a   :  { %835 = vsyncpa [#allocation4], 1 }

</bundles_post_ra>
